<compile_context>
chip_gen: v5e
topology: v5e:2x2
jax: 0.10.0
libtpu: 0.0.40
codegen_flags: <defaults>
</compile_context>

<pallas_src>
import jax
import jax.numpy as jnp
from jax.experimental import pallas as pl
from jax.experimental.pallas import tpu as pltpu


# ----------------------------------------------------------------------------- q FFN
def _q_ffn_kernel(q_ref, w1q_ref, b1q_ref, w2q_ref, b2q_ref, qo_ref):
    # One dense (B, D) @ (D, FF) / (FF, D) pass for the whole batch.
    h = jnp.maximum(
        jnp.dot(q_ref[...], w1q_ref[...], preferred_element_type=jnp.float32)
        + b1q_ref[...],
        0.0,
    )
    qo_ref[...] = (
        jnp.dot(h.astype(jnp.bfloat16), w2q_ref[...],
                preferred_element_type=jnp.float32)
        + b2q_ref[...]
    )


# ----------------------------------------------------------------------- main kernel
def _ag_attention_kernel(
    v_ref, qo_ref, m_ref,
    w1v_ref, b1v_ref, w2v_ref, b2v_ref,
    w1l_ref, b1l_ref, w2l_ref, b2l_ref,
    out_ref,
):
    TB, N, D = v_ref.shape
    FF = w1v_ref.shape[1]

    # --- lin_v : FFN over all TB*N object rows in one MXU pass (bf16 in, f32 acc)
    v2 = v_ref[...].reshape(TB * N, D)                                   # bf16
    hv = jnp.maximum(
        jnp.dot(v2, w1v_ref[...], preferred_element_type=jnp.float32) + b1v_ref[...],
        0.0,
    )                                                                    # (TB*N, FF) f32
    vo = (
        jnp.dot(hv.astype(jnp.bfloat16), w2v_ref[...],
                preferred_element_type=jnp.float32)
        + b2v_ref[...]
    )                                                                    # (TB*N, D)  f32

    # --- gate with precomputed q features (f32), broadcast over objects
    x = vo.reshape(TB, N, D) * qo_ref[...][:, None, :]                   # (TB, N, D) f32
    x2 = x.reshape(TB * N, D).astype(jnp.bfloat16)

    # --- lin : D -> FF -> 1 ; final 1-wide projection done as a lane reduction
    hl = jnp.maximum(
        jnp.dot(x2, w1l_ref[...], preferred_element_type=jnp.float32) + b1l_ref[...],
        0.0,
    )                                                                    # (TB*N, FF) f32
    logits = jnp.sum(hl.reshape(TB, N, FF) * w2l_ref[...], axis=-1) + b2l_ref[0, 0]
    # (TB, N) lane-major logits

    # --- masked fill + softmax over the object (lane) axis, all in f32
    logits = jnp.where(m_ref[...] > 0.0, -1.0e9, logits)
    mx = jnp.max(logits, axis=-1, keepdims=True)
    e = jnp.exp(logits - mx)
    s = jnp.sum(e, axis=-1, keepdims=True)
    out_ref[...] = e * pl.reciprocal(s, approx=True)


# --------------------------------------------------------------------------- wrapper
def ag_attention(v, q, v_mask, params):
    """v: (B,N,D) f32, q: (B,D) f32, v_mask: (B,1,1,N) bool -> (B,N) f32."""
    B, N, D = v.shape
    FF = params["w1v"].shape[1]
    bf16, f32 = jnp.bfloat16, jnp.float32

    # Stage 1: qo = FFN_q(q) once for the whole batch (hoisted out of the grid).
    qo = pl.pallas_call(
        _q_ffn_kernel,
        out_shape=jax.ShapeDtypeStruct((B, D), f32),
    )(
        q.astype(bf16),
        params["w1q"].astype(bf16), params["b1q"].astype(f32),
        params["w2q"].astype(bf16), params["b2q"].astype(f32),
    )

    # Stage 2: per-object FFN + gate + scoring + masked softmax.
    mask = v_mask.reshape(B, N).astype(f32)          # lane-dense (B, N), 1.0 = masked

    # Batch tile: largest divisor of B such that TB*N ~ 256 MXU rows (>=128 on v5e).
    target = max(1, 256 // max(N, 1))
    tb = 1
    for cand in range(1, min(B, target) + 1):
        if B % cand == 0:
            tb = cand

    full = lambda shape: pl.BlockSpec(shape, lambda b: (0, 0))

    out = pl.pallas_call(
        _ag_attention_kernel,
        out_shape=jax.ShapeDtypeStruct((B, N), f32),
        grid=(B // tb,),
        in_specs=[
            pl.BlockSpec((tb, N, D), lambda b: (b, 0, 0)),               # v   (bf16)
            pl.BlockSpec((tb, D), lambda b: (b, 0)),                     # qo  (f32)
            pl.BlockSpec((tb, N), lambda b: (b, 0)),                     # mask(f32)
            full((D, FF)), full((1, FF)), full((FF, D)), full((1, D)),   # lin_v
            full((D, FF)), full((1, FF)), full((1, FF)),                 # lin (w1,b1,w2)
            pl.BlockSpec(memory_space=pltpu.MemorySpace.SMEM),           # b2l scalar
        ],
        out_specs=pl.BlockSpec((tb, N), lambda b: (b, 0)),
        compiler_params=pltpu.CompilerParams(
            dimension_semantics=("parallel",),
            vmem_limit_bytes=64 * 1024 * 1024,
        ),
    )(
        v.astype(bf16), qo, mask,
        params["w1v"].astype(bf16), params["b1v"].astype(f32),
        params["w2v"].astype(bf16), params["b2v"].astype(f32),
        params["w1l"].astype(bf16), params["b1l"].astype(f32),
        params["w2l"].astype(f32),
        params["b2l"].astype(f32),
    )
    return out


# ------------------------------------------------------------------------- reference
def _reference(v, q, v_mask, p):
    """Pure-JAX (f32) reproduction of the PyTorch forward (eval mode)."""
    def ffn(x, w1, b1, w2, b2):
        return jnp.maximum(x @ w1 + b1, 0.0) @ w2 + b2

    vv = ffn(v, p["w1v"], p["b1v"][0], p["w2v"], p["b2v"][0])
    qq = ffn(q, p["w1q"], p["b1q"][0], p["w2q"], p["b2q"][0])
    x = vv * qq[:, None, :]
    h = jnp.maximum(x @ p["w1l"] + p["b1l"][0], 0.0)
    logits = jnp.sum(h * p["w2l"][0], axis=-1) + p["b2l"][0, 0]
    logits = jnp.where(v_mask.reshape(v.shape[0], v.shape[1]), -1.0e9, logits)
    return jax.nn.softmax(logits, axis=1)


def _init_params(key, hidden, ff):
    ks = jax.random.split(key, 8)
    s = 0.1
    return {
        # lin_v : FFN (hidden -> ff -> hidden)
        "w1v": jax.random.normal(ks[0], (hidden, ff), jnp.float32) * s,
        "b1v": jnp.zeros((1, ff), jnp.float32),
        "w2v": jax.random.normal(ks[1], (ff, hidden), jnp.float32) * s,
        "b2v": jnp.zeros((1, hidden), jnp.float32),
        # lin_q : FFN (hidden -> ff -> hidden)
        "w1q": jax.random.normal(ks[2], (hidden, ff), jnp.float32) * s,
        "b1q": jnp.zeros((1, ff), jnp.float32),
        "w2q": jax.random.normal(ks[3], (ff, hidden), jnp.float32) * s,
        "b2q": jnp.zeros((1, hidden), jnp.float32),
        # lin : MLP (hidden -> ff -> 1)
        "w1l": jax.random.normal(ks[4], (hidden, ff), jnp.float32) * s,
        "b1l": jnp.zeros((1, ff), jnp.float32),
        "w2l": jax.random.normal(ks[5], (1, ff), jnp.float32) * s,   # final proj row
        "b2l": jnp.zeros((1, 1), jnp.float32),
    }
    # NOTE: dropout (DROPOUT_R) is identity at inference, so it is omitted.


if __name__ == "__main__":
    B, N, HIDDEN, FF = 2, 8, 32, 64   # batch, num_obj, HIDDEN_SIZE, FF_SIZE

    key = jax.random.PRNGKey(0)
    k_v, k_q, k_p = jax.random.split(key, 3)

    v = jax.random.normal(k_v, (B, N, HIDDEN), jnp.float32)
    q = jax.random.normal(k_q, (B, HIDDEN), jnp.float32)
    # mask out the last 2 objects of batch 0 and last 3 of batch 1
    valid = jnp.array([N - 2, N - 3])
    v_mask = (jnp.arange(N)[None, :] >= valid[:, None]).reshape(B, 1, 1, N)

    params = _init_params(k_p, HIDDEN, FF)

    out = jax.block_until_ready(ag_attention(v, q, v_mask, params))
    ref = jax.block_until_ready(_reference(v, q, v_mask, params))

    assert out.shape == (B, N)
    # bf16 matmul inputs (f32 accumulation) vs. pure-f32 reference => loose tolerance.
    assert jnp.allclose(out, ref, rtol=2e-2, atol=2e-3), (out, ref)
    print("KERNEL_OK")
</pallas_src>

<mosaic_0001>
module attributes {stable_mosaic.version = 11 : i64} {
  func.func @_q_ffn_kernel(%arg0: memref<2x32xbf16, #tpu.memory_space<vmem>>, %arg1: memref<32x64xbf16, #tpu.memory_space<vmem>>, %arg2: memref<1x64xf32, #tpu.memory_space<vmem>>, %arg3: memref<64x32xbf16, #tpu.memory_space<vmem>>, %arg4: memref<1x32xf32, #tpu.memory_space<vmem>>, %arg5: memref<2x32xf32, #tpu.memory_space<vmem>>) attributes {dimension_semantics = [], scalar_prefetch = 0 : i64, scratch_operands = 0 : i64, tpu.core_type = #tpu.core_type<tc>} {
    %c0 = arith.constant 0 : index
    %c0_0 = arith.constant 0 : index
    %0 = vector.load %arg0[%c0, %c0_0] : memref<2x32xbf16, #tpu.memory_space<vmem>>, vector<2x32xbf16>
    %c0_1 = arith.constant 0 : index
    %c0_2 = arith.constant 0 : index
    %1 = vector.load %arg1[%c0_1, %c0_2] : memref<32x64xbf16, #tpu.memory_space<vmem>>, vector<32x64xbf16>
    %cst = arith.constant dense<0.000000e+00> : vector<2x64xf32>
    %2 = tpu.matmul %0, %1, %cst {dimension_numbers = #tpu.dot_dimension_numbers<[1], [0], [0], [1], [0, 0, 1, 1], [], []>} : vector<2x32xbf16>, vector<32x64xbf16>, vector<2x64xf32> -> vector<2x64xf32>
    %c0_3 = arith.constant 0 : index
    %c0_4 = arith.constant 0 : index
    %3 = vector.load %arg2[%c0_3, %c0_4] : memref<1x64xf32, #tpu.memory_space<vmem>>, vector<1x64xf32>
    %4 = vector.broadcast %3 : vector<1x64xf32> to vector<2x64xf32>
    %5 = arith.addf %2, %4 : vector<2x64xf32>
    %cst_5 = arith.constant 0.000000e+00 : f32
    %6 = vector.broadcast %cst_5 : f32 to vector<2x64xf32>
    %7 = arith.maximumf %5, %6 : vector<2x64xf32>
    %8 = arith.truncf %7 : vector<2x64xf32> to vector<2x64xbf16>
    %c0_6 = arith.constant 0 : index
    %c0_7 = arith.constant 0 : index
    %9 = vector.load %arg3[%c0_6, %c0_7] : memref<64x32xbf16, #tpu.memory_space<vmem>>, vector<64x32xbf16>
    %cst_8 = arith.constant dense<0.000000e+00> : vector<2x32xf32>
    %10 = tpu.matmul %8, %9, %cst_8 {dimension_numbers = #tpu.dot_dimension_numbers<[1], [0], [0], [1], [0, 0, 1, 1], [], []>} : vector<2x64xbf16>, vector<64x32xbf16>, vector<2x32xf32> -> vector<2x32xf32>
    %c0_9 = arith.constant 0 : index
    %c0_10 = arith.constant 0 : index
    %11 = vector.load %arg4[%c0_9, %c0_10] : memref<1x32xf32, #tpu.memory_space<vmem>>, vector<1x32xf32>
    %12 = vector.broadcast %11 : vector<1x32xf32> to vector<2x32xf32>
    %13 = arith.addf %10, %12 : vector<2x32xf32>
    %c0_11 = arith.constant 0 : index
    %c0_12 = arith.constant 0 : index
    %14 = vector.load %arg5[%c0_11, %c0_12] : memref<2x32xf32, #tpu.memory_space<vmem>>, vector<2x32xf32>
    tpu.vector_store %arg5[%c0_11, %c0_12], %13 {strides = array<i32>} : memref<2x32xf32, #tpu.memory_space<vmem>>, vector<2x32xf32>,
    return
  }
}

</mosaic_0001>

<bundles_post_ra>
// kernel: tpu_custom_call.1
= control target key start
LH: loop header
LB: loop body
LE: loop exit
PB: predicated region body
PF: predicated region fallthrough
CT: control target
= control target key end

     0   :  { %s255_s0 = inlined_call_operand.vmem [shape: bf16[2,32], index: 0, kind: input, shape index: {}]   ;;  %s256_s1 = inlined_call_operand.vmem [shape: bf16[32,64], index: 1, kind: input, shape index: {}]   ;;  %s257_s2 = inlined_call_operand.vmem [shape: f32[1,64], index: 2, kind: input, shape index: {}]   ;;  %s258_s3 = inlined_call_operand.vmem [shape: bf16[64,32], index: 3, kind: input, shape index: {}]   ;;  %s259_s4 = inlined_call_operand.vmem [shape: f32[1,32], index: 4, kind: input, shape index: {}]   ;;  %s260_s5 = inlined_call_operand.hbm [shape: f32[2,32], index: 5, kind: output, shape index: {}]  }
   0x1   :  { %v160_v0 = vld [vmem:[%s256_s1 + $0x8] sm:$0xff]  ;;  %v164_v1 = vld [vmem:[%s258_s3 + $0x18] sm:$0xff]  ;;  %v159_v2 = vld [vmem:[%s256_s1] sm:$0xff] }
   0x2   :  { %53 = vmatpush.bf16.msra.mxu0 %v160_v0 }
   0x3   :  { %10 = vsyncpa [#allocation3], 0  ;;  %106 = vmatpush.bf16.msra.mxu1 %v164_v1  ;;  %v163_v3 = vld [vmem:[%s258_s3 + $0x10] sm:$0xff]  ;;  %v22_v4 = vld [vmem:[%s255_s0] sm:$0x1]  ;;  %vm43_vm0 = vcmask 261120  }
   0x4   :  { %v162_v5 = vld [vmem:[%s258_s3 + $0x8] sm:$0xff]  ;;  %v161_v6 = vld [vmem:[%s258_s3] sm:$0xff]  ;;  %vm98_vm1 = vcmask 523264   ;;  %s194_s9 = smov [#allocation2]   ;;  %s124_s12 = sshll.u32 %s260_s5, 4  ;;  %vm115_vm2 = vcmask 254976   ;;  %s125_s12 = int_to_ptr.hbm [resolvable:$true] %s124_s12 }
   0x5   :  { %v166_v7 = vld [vmem:[%s257_s2] ss:$0 sm:$0xff]  ;;  %s122_s10 = sshll.u32 %s194_s9, 4  ;;  %s123_s10 = int_to_ptr.vmem [resolvable:$true] %s122_s10 }
   0x6   :  { %54 = vmatpush.bf16.msra.mxu0 %v159_v2  ;;  %v167_v13 = vld [vmem:[%s259_s4] ss:$0 sm:$0xff] }
   0x7   :  { %107 = vmatpush.bf16.msra.mxu1 %v163_v3 }
   0x9   :  { %141 = vmatmul.msk.bf16.vlgmr.msra.gmra.mxu0 %vm43_vm0, %v22_v4 }
   0xb   :  { %108 = vmatpush.bf16.msra.mxu1 %v162_v5 }
   0xf   :  { %109 = vmatpush.bf16.msra.mxu1 %v161_v6 }
  0x86   :  { %v56_v8 = vpop.f32.mrf.mxu0 }
  0x87   :  { %v57_v9 = vadd.f32 %v166_v7, %v56_v8 }
  0x89   :  { %v60_v10 = vmax.f32 %v57_v9, 0.0 }
  0x8b   :  { %v61_v11 = vpack.c.bf16 %v60_v10, %v60_v10 }
  0x8d   :  { %158 = vmatmul.msk.bf16.vlgmr.msra.gmra.mxu1 %vm98_vm1, %v61_v11 }
  0x8e   :  { %v58_v12 = vpop.f32.mrf.mxu0 }
 0x10a   :  { %v111_v14 = vpop.f32.mrf.mxu1 }
 0x10b   :  { %v112_v15 = vadd.f32 %v167_v13, %v111_v14 }
 0x10d   :  { %116 = vst.msk [vmem:[#allocation2] sm:$0x3] %vm115_vm2, %v112_v15 }
 0x10e   :  { %127 = dma.vmem_to_hbm [thread:$0]  %s123_s10, 32, %s125_s12, [#allocation3]  }
 0x112   :  { %v113_v16 = vpop.f32.mrf.mxu1 }
 0x113   :  { %192 = dma.done.wait [#allocation3], 32  }
 0x114   :  { %193 = vsyncadd [#allocation3], 4294967264 }
 0x115   :  { %132 = vsyncpa [#allocation3], 1 }

</bundles_post_ra>
